<compile_context>
chip_gen: v5e
topology: v5e:2x2
jax: 0.10.0
libtpu: 0.0.40
codegen_flags: <defaults>
</compile_context>

<pallas_src>
import jax
import jax.numpy as jnp
from jax import lax
from jax.experimental import pallas as pl
from jax.experimental.pallas import tpu as pltpu

TEMPERATURE = 0.5
INV_TEMPERATURE = 1.0 / TEMPERATURE       # logit scale, folded into p operand
SHIFT = INV_TEMPERATURE                   # logits <= 1/T since rows unit-norm
EPS = 1e-12                               # F.normalize eps
EPS_SQ = EPS * EPS                        # used under rsqrt


def _ntxent_tile_kernel(z_ref, p_ref, out_ref, zn_ref, acc_ref, diag_ref):
    """One (pair, row-tile, col-tile) step of the symmetric NT-Xent loss."""
    i = pl.program_id(1)
    j = pl.program_id(2)
    last_j = pl.num_programs(2) - 1

    # Row-tile setup (once per (pair, i)): normalize z rows, zero the sum-exp.
    @pl.when(j == 0)
    def _():
        z = z_ref[...].astype(jnp.float32)
        inv_z = lax.rsqrt(jnp.maximum(jnp.sum(z * z, axis=-1, keepdims=True),
                                      EPS_SQ))
        zn_ref[...] = z * inv_z
        acc_ref[...] = jnp.zeros_like(acc_ref)

    # Normalize this column tile and fold in 1/temperature (O(T*D), not O(T*T)).
    p = p_ref[...].astype(jnp.float32)
    inv_p = lax.rsqrt(jnp.maximum(jnp.sum(p * p, axis=-1, keepdims=True),
                                  EPS_SQ))
    pn = p * (inv_p * INV_TEMPERATURE)

    zn = zn_ref[...]

    # Logits tile on the MXU; contraction over the lane (feature) dim of both
    # operands -> no materialized transpose of p.
    logits = lax.dot_general(zn, pn, (((1,), (1,)), ((), ())),
                             preferred_element_type=jnp.float32)

    # Constant-shift logsumexp accumulation: exp(logits - SHIFT) <= 1 always.
    acc_ref[...] += jnp.sum(jnp.exp(logits - SHIFT), axis=-1, keepdims=True)

    # Diagonal logit (label = row index) via a row-wise dot: O(T*D), no mask.
    @pl.when(i == j)
    def _():
        diag_ref[...] = jnp.sum(zn * pn, axis=-1, keepdims=True)

    # Finalize this row tile: per-row CE = logsumexp - diagonal logit.
    @pl.when(j == last_j)
    def _():
        out_ref[...] = (jnp.log(acc_ref[...]) + SHIFT) - diag_ref[...]


def _pick_tile(n: int) -> int:
    for t in (512, 256, 128, 64, 32, 16, 8):
        if n % t == 0:
            return t
    return n  # single full-extent tile (allowed by BlockSpec rules)


def _vmem_limit_bytes(tile: int, d: int) -> int:
    f32 = 4
    need = f32 * (
        2 * 2 * tile * d      # z / p input blocks, double-buffered
        + tile * d            # zn scratch
        + 3 * tile * tile     # logits tile + exp temporaries (headroom)
        + 6 * tile            # acc / diag / out
    )
    # Headroom, but never above v7x physical VMEM (64 MiB).
    return int(min(max(2 * need, 8 << 20), 64 << 20))


def our_loss(fg_z1, fg_p1, fg_z2, fg_p2, bg_z1, bg_p1, bg_z2, bg_p2):
    n = fg_z1.shape[0] + bg_z1.shape[0]
    d = fg_z1.shape[-1]

    # TODO(synk): the fg/bg concatenation stays as XLA glue (one extra pass over
    # the embeddings); a BlockSpec index_map cannot select between distinct
    # input arrays, so folding it into the kernel would need manual DMA.
    # Pair 0: criterion(p2, z1); pair 1: criterion(p1, z2).
    z = jnp.concatenate([fg_z1, bg_z1, fg_z2, bg_z2], axis=0).reshape(2, n, d)
    p = jnp.concatenate([fg_p2, bg_p2, fg_p1, bg_p1], axis=0).reshape(2, n, d)

    tile = _pick_tile(n)
    n_tiles = n // tile

    row_losses = pl.pallas_call(
        _ntxent_tile_kernel,
        out_shape=jax.ShapeDtypeStruct((2, n, 1), jnp.float32),
        grid=(2, n_tiles, n_tiles),
        in_specs=[
            pl.BlockSpec((None, tile, d), lambda pair, i, j: (pair, i, 0)),
            pl.BlockSpec((None, tile, d), lambda pair, i, j: (pair, j, 0)),
        ],
        out_specs=pl.BlockSpec((None, tile, 1), lambda pair, i, j: (pair, i, 0)),
        scratch_shapes=[
            pltpu.VMEM((tile, d), jnp.float32),   # normalized z rows (cached)
            pltpu.VMEM((tile, 1), jnp.float32),   # running sum of exp
            pltpu.VMEM((tile, 1), jnp.float32),   # diagonal logits
        ],
        compiler_params=pltpu.CompilerParams(
            dimension_semantics=("parallel", "parallel", "arbitrary"),
            vmem_limit_bytes=_vmem_limit_bytes(tile, d),
        ),
    )(z, p)

    # mean over all 2N per-row losses == 0.5 * (mean(term A) + mean(term B)).
    return jnp.mean(row_losses)


def _reference_loss(fg_z1, fg_p1, fg_z2, fg_p2, bg_z1, bg_p1, bg_z2, bg_p2):
    """Pure-JAX reference for validation."""
    def norm(x):
        return x / jnp.maximum(jnp.linalg.norm(x, axis=-1, keepdims=True), EPS)

    def ntxent(p, z):
        zn, pn = norm(z), norm(p)
        logits = zn @ pn.T / TEMPERATURE
        idx = jnp.arange(logits.shape[0])
        logp = jax.nn.log_softmax(logits, axis=-1)
        return -jnp.mean(logp[idx, idx])

    z1 = jnp.concatenate([fg_z1, bg_z1], axis=0)
    p1 = jnp.concatenate([fg_p1, bg_p1], axis=0)
    z2 = jnp.concatenate([fg_z2, bg_z2], axis=0)
    p2 = jnp.concatenate([fg_p2, bg_p2], axis=0)
    return 0.5 * (ntxent(p2, z1) + ntxent(p1, z2))


if __name__ == "__main__":
    B, D = 4, 32  # per-group batch and embedding dim (N = 2*B = 8 after concat)
    key = jax.random.PRNGKey(0)
    keys = jax.random.split(key, 8)
    fg_z1, fg_p1, fg_z2, fg_p2, bg_z1, bg_p1, bg_z2, bg_p2 = (
        jax.random.normal(k, (B, D), dtype=jnp.float32) for k in keys
    )

    loss = our_loss(fg_z1, fg_p1, fg_z2, fg_p2, bg_z1, bg_p1, bg_z2, bg_p2)
    loss = jax.block_until_ready(loss)

    ref = _reference_loss(fg_z1, fg_p1, fg_z2, fg_p2,
                          bg_z1, bg_p1, bg_z2, bg_p2)
    assert jnp.isfinite(loss), "loss is not finite"
    assert jnp.allclose(loss, ref, atol=1e-4, rtol=1e-4), (loss, ref)

    print("KERNEL_OK")
</pallas_src>

<mosaic_0001>
module attributes {stable_mosaic.version = 11 : i64} {
  func.func @_ntxent_tile_kernel(%arg0: i32, %arg1: i32, %arg2: i32, %arg3: memref<1x8x32xf32, #tpu.memory_space<vmem>>, %arg4: memref<1x8x32xf32, #tpu.memory_space<vmem>>, %arg5: memref<1x8x1xf32, #tpu.memory_space<vmem>>, %arg6: memref<8x32xf32, #tpu.memory_space<vmem>>, %arg7: memref<8x1xf32, #tpu.memory_space<vmem>>, %arg8: memref<8x1xf32, #tpu.memory_space<vmem>>) attributes {dimension_semantics = [#tpu.dimension_semantics<parallel>, #tpu.dimension_semantics<parallel>, #tpu.dimension_semantics<arbitrary>], iteration_bounds = array<i64: 2, 1, 1>, scalar_prefetch = 0 : i64, scratch_operands = 3 : i64, tpu.core_type = #tpu.core_type<tc>, window_params = [{transform_indices = @transform_0, window_bounds = array<i64: 1, 8, 32>}, {transform_indices = @transform_1, window_bounds = array<i64: 1, 8, 32>}, {transform_indices = @transform_2, window_bounds = array<i64: 1, 8, 1>}]} {
    %c0_i32 = arith.constant 0 : i32
    %0 = arith.cmpi eq, %arg2, %c0_i32 : i32
    %1 = arith.extui %0 : i1 to i32
    %c0_i32_0 = arith.constant 0 : i32
    %2 = arith.cmpi ne, %1, %c0_i32_0 : i32
    scf.if %2 {
      %c0_17 = arith.constant 0 : index
      %c0_18 = arith.constant 0 : index
      %c0_19 = arith.constant 0 : index
      %31 = vector.load %arg3[%c0_17, %c0_18, %c0_19] : memref<1x8x32xf32, #tpu.memory_space<vmem>>, vector<1x8x32xf32>
      %32 = vector.shape_cast %31 : vector<1x8x32xf32> to vector<8x32xf32>
      %33 = arith.mulf %32, %32 : vector<8x32xf32>
      %cst_20 = arith.constant dense<0.000000e+00> : vector<8xf32>
      %34 = vector.multi_reduction <add>, %33, %cst_20 [1] : vector<8x32xf32> to vector<8xf32>
      %35 = vector.shape_cast %34 : vector<8xf32> to vector<8x1xf32>
      %cst_21 = arith.constant 1.000000e-24 : f32
      %36 = vector.broadcast %cst_21 : f32 to vector<8x1xf32>
      %37 = arith.maximumf %35, %36 : vector<8x1xf32>
      %38 = math.rsqrt %37 : vector<8x1xf32>
      %39 = vector.broadcast %38 : vector<8x1xf32> to vector<8x32xf32>
      %40 = arith.mulf %32, %39 : vector<8x32xf32>
      %c0_22 = arith.constant 0 : index
      %c0_23 = arith.constant 0 : index
      %41 = vector.load %arg6[%c0_22, %c0_23] : memref<8x32xf32, #tpu.memory_space<vmem>>, vector<8x32xf32>
      tpu.vector_store %arg6[%c0_22, %c0_23], %40 {strides = array<i32>} : memref<8x32xf32, #tpu.memory_space<vmem>>, vector<8x32xf32>,
      %cst_24 = arith.constant 0.000000e+00 : f32
      %42 = vector.broadcast %cst_24 : f32 to vector<8x1xf32>
      %c0_25 = arith.constant 0 : index
      %c0_26 = arith.constant 0 : index
      %43 = vector.load %arg7[%c0_25, %c0_26] : memref<8x1xf32, #tpu.memory_space<vmem>>, vector<8x1xf32>
      tpu.vector_store %arg7[%c0_25, %c0_26], %42 {strides = array<i32>} : memref<8x1xf32, #tpu.memory_space<vmem>>, vector<8x1xf32>,
    } else {
    }
    %c0 = arith.constant 0 : index
    %c0_1 = arith.constant 0 : index
    %c0_2 = arith.constant 0 : index
    %3 = vector.load %arg4[%c0, %c0_1, %c0_2] : memref<1x8x32xf32, #tpu.memory_space<vmem>>, vector<1x8x32xf32>
    %4 = vector.shape_cast %3 : vector<1x8x32xf32> to vector<8x32xf32>
    %5 = arith.mulf %4, %4 : vector<8x32xf32>
    %cst = arith.constant dense<0.000000e+00> : vector<8xf32>
    %6 = vector.multi_reduction <add>, %5, %cst [1] : vector<8x32xf32> to vector<8xf32>
    %7 = vector.shape_cast %6 : vector<8xf32> to vector<8x1xf32>
    %cst_3 = arith.constant 1.000000e-24 : f32
    %8 = vector.broadcast %cst_3 : f32 to vector<8x1xf32>
    %9 = arith.maximumf %7, %8 : vector<8x1xf32>
    %10 = math.rsqrt %9 : vector<8x1xf32>
    %cst_4 = arith.constant 2.000000e+00 : f32
    %11 = vector.broadcast %cst_4 : f32 to vector<8x1xf32>
    %12 = arith.mulf %10, %11 : vector<8x1xf32>
    %13 = vector.broadcast %12 : vector<8x1xf32> to vector<8x32xf32>
    %14 = arith.mulf %4, %13 : vector<8x32xf32>
    %c0_5 = arith.constant 0 : index
    %c0_6 = arith.constant 0 : index
    %15 = vector.load %arg6[%c0_5, %c0_6] : memref<8x32xf32, #tpu.memory_space<vmem>>, vector<8x32xf32>
    %cst_7 = arith.constant dense<0.000000e+00> : vector<8x8xf32>
    %16 = tpu.matmul %15, %14, %cst_7 {dimension_numbers = #tpu.dot_dimension_numbers<[1], [1], [0], [0], [0, 0, 1, 0], [], []>} : vector<8x32xf32>, vector<8x32xf32>, vector<8x8xf32> -> vector<8x8xf32>
    %c0_8 = arith.constant 0 : index
    %c0_9 = arith.constant 0 : index
    %17 = vector.load %arg7[%c0_8, %c0_9] : memref<8x1xf32, #tpu.memory_space<vmem>>, vector<8x1xf32>
    %cst_10 = arith.constant 2.000000e+00 : f32
    %18 = vector.broadcast %cst_10 : f32 to vector<8x8xf32>
    %19 = arith.subf %16, %18 : vector<8x8xf32>
    %20 = math.exp %19 : vector<8x8xf32>
    %cst_11 = arith.constant dense<0.000000e+00> : vector<8xf32>
    %21 = vector.multi_reduction <add>, %20, %cst_11 [1] : vector<8x8xf32> to vector<8xf32>
    %22 = vector.shape_cast %21 : vector<8xf32> to vector<8x1xf32>
    %23 = arith.addf %17, %22 : vector<8x1xf32>
    %c0_12 = arith.constant 0 : index
    %c0_13 = arith.constant 0 : index
    %24 = vector.load %arg7[%c0_12, %c0_13] : memref<8x1xf32, #tpu.memory_space<vmem>>, vector<8x1xf32>
    tpu.vector_store %arg7[%c0_12, %c0_13], %23 {strides = array<i32>} : memref<8x1xf32, #tpu.memory_space<vmem>>, vector<8x1xf32>,
    %25 = arith.cmpi eq, %arg1, %arg2 : i32
    %26 = arith.extui %25 : i1 to i32
    %c0_i32_14 = arith.constant 0 : i32
    %27 = arith.cmpi ne, %26, %c0_i32_14 : i32
    scf.if %27 {
      %31 = arith.mulf %15, %14 : vector<8x32xf32>
      %cst_17 = arith.constant dense<0.000000e+00> : vector<8xf32>
      %32 = vector.multi_reduction <add>, %31, %cst_17 [1] : vector<8x32xf32> to vector<8xf32>
      %33 = vector.shape_cast %32 : vector<8xf32> to vector<8x1xf32>
      %c0_18 = arith.constant 0 : index
      %c0_19 = arith.constant 0 : index
      %34 = vector.load %arg8[%c0_18, %c0_19] : memref<8x1xf32, #tpu.memory_space<vmem>>, vector<8x1xf32>
      tpu.vector_store %arg8[%c0_18, %c0_19], %33 {strides = array<i32>} : memref<8x1xf32, #tpu.memory_space<vmem>>, vector<8x1xf32>,
    } else {
    }
    %c0_i32_15 = arith.constant 0 : i32
    %28 = arith.cmpi eq, %arg2, %c0_i32_15 : i32
    %29 = arith.extui %28 : i1 to i32
    %c0_i32_16 = arith.constant 0 : i32
    %30 = arith.cmpi ne, %29, %c0_i32_16 : i32
    scf.if %30 {
      %c0_17 = arith.constant 0 : index
      %c0_18 = arith.constant 0 : index
      %31 = vector.load %arg7[%c0_17, %c0_18] : memref<8x1xf32, #tpu.memory_space<vmem>>, vector<8x1xf32>
      %32 = math.log %31 : vector<8x1xf32>
      %cst_19 = arith.constant 2.000000e+00 : f32
      %33 = vector.broadcast %cst_19 : f32 to vector<8x1xf32>
      %34 = arith.addf %32, %33 : vector<8x1xf32>
      %c0_20 = arith.constant 0 : index
      %c0_21 = arith.constant 0 : index
      %35 = vector.load %arg8[%c0_20, %c0_21] : memref<8x1xf32, #tpu.memory_space<vmem>>, vector<8x1xf32>
      %36 = arith.subf %34, %35 : vector<8x1xf32>
      %c0_22 = arith.constant 0 : index
      %c0_23 = arith.constant 0 : index
      %c0_24 = arith.constant 0 : index
      %37 = vector.load %arg5[%c0_22, %c0_23, %c0_24] : memref<1x8x1xf32, #tpu.memory_space<vmem>>, vector<1x8x1xf32>
      %38 = vector.shape_cast %37 : vector<1x8x1xf32> to vector<8x1xf32>
      %39 = vector.shape_cast %36 : vector<8x1xf32> to vector<1x8x1xf32>
      tpu.vector_store %arg5[%c0_22, %c0_23, %c0_24], %39 {strides = array<i32>} : memref<1x8x1xf32, #tpu.memory_space<vmem>>, vector<1x8x1xf32>,
    } else {
    }
    return
  }
  func.func @transform_0(%arg0: i32, %arg1: i32, %arg2: i32) -> (i32, i32, i32) {
    %c0_i32 = arith.constant 0 : i32
    %c0_i32_0 = arith.constant 0 : i32
    return %arg0, %arg1, %c0_i32 : i32, i32, i32
  }
  func.func @transform_1(%arg0: i32, %arg1: i32, %arg2: i32) -> (i32, i32, i32) {
    %c0_i32 = arith.constant 0 : i32
    %c0_i32_0 = arith.constant 0 : i32
    return %arg0, %arg2, %c0_i32 : i32, i32, i32
  }
  func.func @transform_2(%arg0: i32, %arg1: i32, %arg2: i32) -> (i32, i32, i32) {
    %c0_i32 = arith.constant 0 : i32
    %c0_i32_0 = arith.constant 0 : i32
    return %arg0, %arg1, %c0_i32 : i32, i32, i32
  }
}

</mosaic_0001>

<bundles_post_ra>
// kernel: tpu_custom_call.1
= control target key start
LH: loop header
LB: loop body
LE: loop exit
PB: predicated region body
PF: predicated region fallthrough
CT: control target
= control target key end

     0   :  { %7 = vsyncpa [#allocation6], 0  ;;  %s768_s0 = inlined_call_operand.hbm [shape: f32[2,8,32], index: 0, kind: input, shape index: {}]   ;;  %s769_s1 = inlined_call_operand.hbm [shape: f32[2,8,32], index: 1, kind: input, shape index: {}]   ;;  %s770_s2 = inlined_call_operand.vmem [shape: f32[2,8,1], index: 2, kind: output, shape index: {}]  }
   0x1   :  { %9 = vsyncpa [#allocation6 + $0x1], 0 }
   0x2   :  { %10 = vsyncpa [#allocation8], 0 }
   0x3   :  { %12 = vsyncpa [#allocation8 + $0x1], 0  ;;  %s663_s9 = smov 0   ;;  %s665_s10 = smov 0  }
   0x4   :  { %s667_s11 = smov 0   ;;  %s669_s12 = smov 0  }
   0x5   :  { %s671_s13 = smov 0   ;;  %s673_s14 = smov 0  }
   0x6 LB: > { %s445_s15 = sadd.s32 4294967295, %s645_s14   ;;  %s37_s16 = sadd.s32 1, %s641_s13  ;;  %s645_s14 = sphi %s673_s14, %s18_s14   ;;  %s641_s13 = sphi %s671_s13, %s777_s13   ;;  %s637_s12 = sphi %s669_s12, %s776_s12   ;;  %s633_s11 = sphi %s667_s11, %s775_s11   ;;  %s629_s10 = sphi %s665_s10, %s774_s10   ;;  %s625_s9 = sphi %s663_s9, %s773_s9  }
   0x7   : > { %p39_p0 = scmp.ge.s32.totalorder %s37_s16, 2  ;;  %s46_s17 = sadd.s32 1, %s633_s11 }
   0x8   : > { %p53_p1 = scmp.ne.s32.totalorder %s633_s11, %s629_s10  ;;  %p54_p2 = scmp.eq.s32.totalorder %s645_s14, 0 }
   0x9   : > { %s779_s16 = smov (%p39_p0, %s37_s16), 0  ;;  %p59_p4 = scmp.ne.s32.totalorder %s629_s10, %s625_s9 }
   0xa   : > { %p699_p3 = por %p54_p2, %p53_p1  ;;  %s41_s19 = ssub.s32 %s641_s13, %s779_s16 }
   0xb   : > { %p60_p5 = scmp.eq.s32.totalorder %s445_s15, 0  ;;  %p44_p6 = scmp.eq.s32.totalorder %s41_s19, 0 }
   0xc   : > { %p473_p8 = scmp.lt.s32.totalorder %s645_s14, 2  ;;  %s139_s22 = sand.u32 1, %s633_s11  }
   0xd   : > { %p706_p7 = por %p60_p5, %p59_p4  ;;  %s450_s23 = sshll.u32 %s641_s13, 3 }
   0xe   : > { %s712_s21 = scalar_select %p44_p6, %s633_s11, %s46_s17  }
   0xf   : > { %s449_s24 = sshll.u32 %s139_s22, 3  ;;  %s148_s27 = scalar_lea.hbm %s768_s0, %s450_s23 }
  0x10   : > { %s150_s28 = sshll.u32 %s148_s27, 4  ;;  %s143_s29 = scalar_lea.vmem [#allocation5], %s449_s24  ;;  %s151_s28 = int_to_ptr.hbm [resolvable:$true] %s150_s28 }
  0x11   : > { %s152_s30 = sshll.u32 %s143_s29, 4  ;;  %p467_p9 = pnand %p473_p8, %p699_p3  ;;  %s153_s30 = int_to_ptr.vmem [resolvable:$true] %s152_s30 }
  0x12   : > { %p453_p10 = scmp.ge.s32.totalorder %s645_s14, 1  ;;  %p177_p11 = scmp.lt.s32.totalorder %s645_s14, 3 }
  0x13   : > { %s140_s3 = scalar_lea.sflag [#allocation6], %s139_s22  ;;  %s168_s6 = scalar_lea.hbm %s769_s1, %s450_s23 }
  0x14   : > { %469 = dma.hbm_to_vmem [thread:$0]  (!%p467_p9), %s151_s28, 128, %s153_s30, %s140_s3  }
  0x15   : > { %p178_p12 = pnand %p453_p10, %p177_p11  ;;  %s170_s7 = sshll.u32 %s168_s6, 4  ;;  %s171_s7 = int_to_ptr.hbm [resolvable:$true] %s170_s7 }
  0x16   : > { %s163_s8 = scalar_lea.vmem [#allocation7], %s449_s24  ;;  %s160_s15 = scalar_lea.sflag [#allocation8], %s139_s22 }
  0x17   : > { %s172_s9 = sshll.u32 %s163_s8, 4  ;;  %181 = sbr.rel (%p178_p12) target bundleno = 464 (0x1d0), region = 28  ;;  %s173_s9 = int_to_ptr.vmem [resolvable:$true] %s172_s9 }
  0x18   : > { %472 = dma.hbm_to_vmem [thread:$0]  (!%p467_p9), %s171_s7, 128, %s173_s9, %s160_s15  }
  0x19   : > { %s183_s17 = sand.u32 (!%p178_p12), 1, %s629_s10  }
  0x1a   : > { %s454_s18 = sshll.u32 (!%p178_p12), %s183_s17, 3  ;;  %s184_s19 = scalar_lea.sflag (!%p178_p12), [#allocation6], %s183_s17 }
  0x1b   : > { %s187_s25 = scalar_lea.vmem (!%p178_p12), [#allocation5], %s454_s18 }
  0x1c   : > { %616 = dma.done.wait (%p706_p7), %s184_s19, 128  }
  0x1d   : > { %618 = vsyncadd (%p706_p7), %s184_s19, 4294967168  ;;  %s194_s23 = scalar_lea.sflag [#allocation8], %s183_s17  ;;  %s197_s24 = scalar_lea.vmem [#allocation7], %s454_s18 }
  0x1e   : > { %620 = dma.done.wait (%p706_p7), %s194_s23, 128  }
  0x1f   : > { %622 = vsyncadd (%p706_p7), %s194_s23, 4294967168  ;;  %v237_v0 = vld [vmem:[%s187_s25] sm:$0xff]  ;;  %vm239_vm0 = vcmask 261120   ;;  %v258_v2 = vld [vmem:[%s197_s24] sm:$0xff]  ;;  %vm256_vm7 = vcmask 7168   ;;  %v647_v29 = vmov 0.0  }
  0x20   : > { %v238_v1 = vmul.f32 %v237_v0, %v237_v0  ;;  %v259_v4 = vmul.f32 %v258_v2, %v258_v2  ;;  %257 = vst.msk [vmem:[#allocation3] sm:$0xff] %vm256_vm7, %v647_v29  ;;  %vm308_vm8 = vcmask 64512   ;;  %p226_p13 = scmp.lt.s32.totalorder %s637_s12, 1 }
  0x22   : > { %v240_v3 = vsel %vm239_vm0, %v238_v1, 0.0  ;;  %v261_v5 = vsel %vm239_vm0, %v259_v4, 0.0  ;;  %s781_s12 = smov (!%p226_p13, %s637_s12), 1 }
  0x23   : > { %241 = vadd.xlane.f32.xlu0 %v240_v3  ;;  %s456_s20 = sshll.u32 %s781_s12, 3 }
  0x24   : > { %s232_s27 = scalar_lea.vmem %s770_s2, %s456_s20 }
  0x27   : > { %v304_v36 = vld [vmem:[#allocation3] sm:$0xff] }
  0x2b   : > { %262 = vadd.xlane.f32.xlu0 %v261_v5 }
  0x96   : > { %v242_v6 = vpop.xlane.xlu0 %241 }
  0x97   : > { %v243_v7 = vmax.f32 %v242_v6, 1e-24 }
  0x99   : > { %523 = vrsqrt.f32 %v243_v7  ;;  %vm250_vm2 = vweird.f32 %v243_v7 }
  0x9e   : > { %v263_v8 = vpop.xlane.xlu0 %262 }
  0x9f   : > { %v524_v9 = vpop.eup %523  ;;  %v264_v10 = vmax.f32 %v263_v8, 1e-24 }
  0xa0   : > { %v245_v11 = vmul.f32 %v524_v9, %v243_v7  ;;  %vm251_vm1 = vweird.f32 %v524_v9 }
  0xa1   : > { %525 = vrsqrt.f32 %v264_v10  ;;  %vm252_vm3 = vmor %vm250_vm2, %vm251_vm1  ;;  %vm271_vm5 = vweird.f32 %v264_v10 }
  0xa2   : > { %v246_v12 = vmul.f32 %v524_v9, %v245_v11 }
  0xa4   : > { %v247_v13 = vmul.f32 0.5, %v246_v12 }
  0xa6   : > { %v248_v14 = vsub.f32 1.5, %v247_v13 }
  0xa7   : > { %v526_v15 = vpop.eup %525 }
  0xa8   : > { %v249_v16 = vmul.f32 %v524_v9, %v248_v14  ;;  %v266_v17 = vmul.f32 %v526_v15, %v264_v10  ;;  %vm272_vm4 = vweird.f32 %v526_v15 }
  0xa9   : > { %vm273_vm6 = vmor %vm271_vm5, %vm272_vm4 }
  0xaa   : > { %v253_v18 = vsel %vm252_vm3, %v524_v9, %v249_v16  ;;  %v267_v19 = vmul.f32 %v526_v15, %v266_v17 }
  0xab   : > { %v254_v20 = vmul.f32 %v253_v18, %v237_v0 }
  0xac   : > { %v268_v21 = vmul.f32 0.5, %v267_v19 }
  0xad   : > { %255 = vst.msk [vmem:[#allocation2] sm:$0xff] %vm239_vm0, %v254_v20 }
  0xae   : > { %v269_v22 = vsub.f32 1.5, %v268_v21 }
  0xb0   : > { %v270_v23 = vmul.f32 %v526_v15, %v269_v22 }
  0xb2   : > { %v274_v24 = vsel %vm273_vm6, %v526_v15, %v270_v23 }
  0xb3   : > { %v275_v25 = vmul.f32 2.0, %v274_v24 }
  0xb4   : > { %v277_v27 = vld [vmem:[#allocation2] sm:$0xff] }
  0xb5   : > { %v276_v26 = vmul.f32 %v275_v25, %v258_v2 }
  0xb7   : > { %457 = vmatpush.xpose.msk.msra.mxu0 %vm239_vm0, %v276_v26  ;;  %v319_v28 = vmul.f32 %v277_v27, %v276_v26 }
  0xb9   : > { %v320_v35 = vsel %vm239_vm0, %v319_v28, 0.0 }
  0xba   : > { %458 = vmatmul.msk.f32.vlgmr.msra.gmra.mxu0 %vm239_vm0, %v277_v27 }
 0x137   : > { %v301_v30 = vpop.f32.mrf.mxu0 }
 0x138   : > { %v459_v31 = vadd.f32 -2.0, %v301_v30 }
 0x13a   : > { %v306_v32 = vmul.f32 1.442695, %v459_v31 }
 0x13c   : > { %527 = vpow2.f32 %v306_v32 }
 0x142   : > { %v528_v33 = vpop.eup %527 }
 0x143   : > { %v309_v34 = vsel %vm308_vm8, %v528_v33, 0.0 }
 0x144   : > { %310 = vadd.xlane.f32.xlu1 %v309_v34 }
 0x14c   : > { %321 = vadd.xlane.f32.xlu1 %v320_v35 }
 0x1b7   : > { %v311_v37 = vpop.xlane.xlu1 %310 }
 0x1b8   : > { %v312_v38 = vadd.f32 %v311_v37, %v304_v36 }
 0x1ba   : > { %314 = vst.msk [vmem:[#allocation3] sm:$0xff] %vm256_vm7, %v312_v38 }
 0x1bf   : > { %v322_v39 = vpop.xlane.xlu1 %321 }
 0x1c0   : > { %323 = vst.msk [vmem:[#allocation4] sm:$0xff] %vm256_vm7, %v322_v39 }
 0x1c1   : > { %v327_v40 = vld [vmem:[#allocation3] sm:$0xff] }
 0x1c2   : > { %529 = vlog2.f32 %v327_v40 }
 0x1c7   : > { %v331_v44 = vld [vmem:[#allocation4] sm:$0xff] }
 0x1c8   : > { %v530_v41 = vpop.eup %529 }
 0x1c9   : > { %v329_v42 = vmul.f32 0.6931472, %v530_v41 }
 0x1cb   : > { %v330_v43 = vadd.f32 2.0, %v329_v42 }
 0x1cd   : > { %v332_v45 = vsub.f32 %v330_v43, %v331_v44 }
 0x1cf   : > { %333 = vst.msk [vmem:[%s232_s27] sm:$0xff] %vm256_vm7, %v332_v45 }
 0x1d0 PF: > { %s18_s14 = sadd.s32 1, %s645_s14   ;;  %s773_s9 = smov %s629_s10 }
 0x1d1   : > { %p15_p0 = scmp.ge.s32.totalorder %s18_s14, 4   ;;  %s774_s10 = smov %s633_s11 }
 0x1d2   : > { %s775_s11 = smov %s712_s21  ;;  %s776_s12 = smov %s641_s13 }
 0x1d3   : > { %s777_s13 = smov %s779_s16  ;;  %17 = sbr.rel (!%p15_p0) target bundleno = 6 (0x6), region = 93 }
 0x1d8   :  { %359 = vsyncpa [#allocation6], 1 }
 0x1d9   :  { %361 = vsyncpa [#allocation6 + $0x1], 1 }
 0x1da   :  { %362 = vsyncpa [#allocation8], 1 }
 0x1db   :  { %364 = vsyncpa [#allocation8 + $0x1], 1 }

</bundles_post_ra>
